<compile_context>
chip_gen: v7x
topology: tpu7x:2x2x1
jax: 0.10.0
libtpu: 0.0.40
codegen_flags: <defaults>
</compile_context>

<pallas_src>
import functools

import jax
import jax.numpy as jnp
from jax.experimental import pallas as pl
from jax.experimental.pallas import tpu as pltpu

SMOOTH = 1e-5
LANES = 128


def _dice_kernel(score_ref, label_ref, oi_ref, oz_ref, oy_ref, *,
                 hw, tile_hw, tiles_per_core, apply_softmax):
    """Accumulate per-class sum(s*t), sum(s*s), sum(t*t) into output refs.

    score_ref: (C, tile_hw) float block (one batch element, one spatial tile)
    label_ref: (1, tile_hw) int32 block
    o*_ref:    (C, LANES) f32 lane-spread accumulators, resident per core.
    """
    c = pl.program_id(0)   # core / partial-sum slab
    b = pl.program_id(1)   # batch element
    t = pl.program_id(2)   # spatial tile within this core's range

    # First iteration of this core's range: zero the resident accumulators.
    @pl.when((b == 0) & (t == 0))
    def _():
        oi_ref[...] = jnp.zeros_like(oi_ref)
        oz_ref[...] = jnp.zeros_like(oz_ref)
        oy_ref[...] = jnp.zeros_like(oy_ref)

    C = score_ref.shape[0]
    tile_id = c * tiles_per_core + t          # global (unclamped) tile index
    col0 = tile_id * tile_hw                  # global column of lane 0

    lane_iota = jax.lax.broadcasted_iota(jnp.int32, (1, LANES), 1)
    cls_ids = jax.lax.broadcasted_iota(jnp.int32, (C, LANES), 0)

    ai = oi_ref[...]
    az = oz_ref[...]
    ay = oy_ref[...]

    # Unrolled, lane-aligned 128-wide static slices: no relayout, everything
    # stays in vregs; accumulators hit VMEM once per grid step.
    for k in range(tile_hw // LANES):
        sl = slice(k * LANES, (k + 1) * LANES)
        s = score_ref[:, sl].astype(jnp.float32)        # (C, 128)
        labels = label_ref[:, sl]                       # (1, 128)
        # Mask ragged tail / clamped duplicate tiles via global column index.
        valid = (col0 + k * LANES + lane_iota) < hw     # (1, 128)

        if apply_softmax:
            m = jnp.max(s, axis=0, keepdims=True)
            e = jnp.exp(s - m)
            denom = jnp.sum(e, axis=0, keepdims=True)
            s = e * pl.reciprocal(denom)                # 1 divide, C multiplies

        s = jnp.where(valid, s, 0.0)
        oh = jnp.where(valid & (labels == cls_ids), 1.0, 0.0)  # one-hot target

        ai = ai + s * oh
        az = az + s * s
        ay = ay + oh                                    # oh * oh == oh

    oi_ref[...] = ai
    oz_ref[...] = az
    oy_ref[...] = ay


def dice_loss(preds, target, n_classes, weight=None, softmax=False,
              tile_hw=8192, num_cores=2):
    """Pallas DiceLoss forward.

    preds:  (B, C, H, W) float32/bfloat16 scores (logits if softmax=True)
    target: (B, H, W) integer class labels in [0, C)
    """
    B, C, H, W = preds.shape
    assert C == n_classes
    HW = H * W

    # Free reshapes only: no transpose, no pad -> no extra HBM passes.
    score = preds.reshape(B, C, HW)
    labels = target.astype(jnp.int32).reshape(B, 1, HW)

    # Tile sizing: multiple of 128 lanes, capped to the rounded-up spatial
    # extent and to ~4 MiB per score block (safe for v5e's 16 MiB scoped VMEM
    # with double buffering; v6e/v7x default to 32 MiB).
    bytes_per_col = C * score.dtype.itemsize
    vmem_cap_cols = max(LANES, ((4 << 20) // bytes_per_col) // LANES * LANES)
    tile_hw = max(LANES, min(tile_hw, pl.cdiv(HW, LANES) * LANES, vmem_cap_cols))

    n_tiles = pl.cdiv(HW, tile_hw)
    num_cores = max(1, min(num_cores, n_tiles))
    tiles_per_core = pl.cdiv(n_tiles, num_cores)
    grid = (num_cores, B, tiles_per_core)

    def tile_map(c, b, t):
        # Clamp so DMAs stay in bounds; overhanging iterations are fully
        # masked inside the kernel via the global column index.
        return jnp.minimum(c * tiles_per_core + t, n_tiles - 1)

    score_spec = pl.BlockSpec((None, C, tile_hw),
                              lambda c, b, t: (b, 0, tile_map(c, b, t)))
    label_spec = pl.BlockSpec((None, 1, tile_hw),
                              lambda c, b, t: (b, 0, tile_map(c, b, t)))

    acc_shape = jax.ShapeDtypeStruct((num_cores, C, LANES), jnp.float32)
    acc_spec = pl.BlockSpec((None, C, LANES), lambda c, b, t: (c, 0, 0))

    kernel = functools.partial(
        _dice_kernel, hw=HW, tile_hw=tile_hw,
        tiles_per_core=tiles_per_core, apply_softmax=softmax)

    out_i, out_z, out_y = pl.pallas_call(
        kernel,
        out_shape=(acc_shape, acc_shape, acc_shape),
        grid_spec=pltpu.PrefetchScalarGridSpec(
            num_scalar_prefetch=0,
            grid=grid,
            in_specs=[score_spec, label_spec],
            out_specs=[acc_spec, acc_spec, acc_spec],
        ),
        compiler_params=pltpu.CompilerParams(
            dimension_semantics=("parallel", "arbitrary", "arbitrary")),
    )(score, labels)

    # Tiny epilogue in plain JAX: fold cores + lanes, form per-class dice.
    inter = out_i.sum(axis=(0, 2))                     # (C,)
    z_sum = out_z.sum(axis=(0, 2))
    y_sum = out_y.sum(axis=(0, 2))
    dice = (2.0 * inter + SMOOTH) / (z_sum + y_sum + SMOOTH)
    class_losses = 1.0 - dice

    if weight is None:
        weight = [1.0] * n_classes
    w = jnp.asarray(weight, dtype=jnp.float32)
    return jnp.sum(class_losses * w) / n_classes


def dice_loss_ref(preds, target, n_classes, weight=None, softmax=False):
    """Pure-JAX reference mirroring the PyTorch module."""
    if softmax:
        preds = jax.nn.softmax(preds, axis=1)
    oh = jax.nn.one_hot(target, n_classes, axis=1, dtype=jnp.float32)
    if weight is None:
        weight = [1.0] * n_classes
    loss = 0.0
    for i in range(n_classes):
        score = preds[:, i].astype(jnp.float32)
        tgt = oh[:, i]
        inter = jnp.sum(score * tgt)
        y_sum = jnp.sum(tgt * tgt)
        z_sum = jnp.sum(score * score)
        dice = (2.0 * inter + SMOOTH) / (z_sum + y_sum + SMOOTH)
        loss = loss + (1.0 - dice) * weight[i]
    return loss / n_classes


if __name__ == "__main__":
    key = jax.random.PRNGKey(0)
    k1, k2, k3, k4 = jax.random.split(key, 4)

    # Case 1: B=2, C=4, 16x16 (HW multiple of 128), both softmax paths.
    B, C, H, W = 2, 4, 16, 16
    preds = jax.random.normal(k1, (B, C, H, W), dtype=jnp.float32)
    target = jax.random.randint(k2, (B, H, W), 0, C, dtype=jnp.int32)
    for use_softmax in (False, True):
        out = jax.block_until_ready(
            dice_loss(preds, target, C, softmax=use_softmax))
        ref = jax.block_until_ready(
            dice_loss_ref(preds, target, C, softmax=use_softmax))
        assert jnp.allclose(out, ref, rtol=1e-5, atol=1e-5), (use_softmax, out, ref)

    # Case 2: ragged spatial extent (HW=169, not a multiple of 128), small
    # tile to exercise multi-tile + 2-way core split + clamped-tail masking,
    # plus class weights and the softmax path.
    B2, C2, H2, W2 = 2, 4, 13, 13
    preds2 = jax.random.normal(k3, (B2, C2, H2, W2), dtype=jnp.float32)
    target2 = jax.random.randint(k4, (B2, H2, W2), 0, C2, dtype=jnp.int32)
    wts = [0.5, 1.0, 1.5, 2.0]
    out2 = jax.block_until_ready(
        dice_loss(preds2, target2, C2, weight=wts, softmax=True, tile_hw=128))
    ref2 = jax.block_until_ready(
        dice_loss_ref(preds2, target2, C2, weight=wts, softmax=True))
    assert jnp.allclose(out2, ref2, rtol=1e-5, atol=1e-5), (out2, ref2)

    print("KERNEL_OK")
</pallas_src>

<mosaic_0001>
module attributes {stable_mosaic.version = 11 : i64} {
  func.func @_dice_kernel(%arg0: i32, %arg1: i32, %arg2: i32, %arg3: memref<1x4x256xf32, #tpu.memory_space<vmem>>, %arg4: memref<1x1x256xi32, #tpu.memory_space<vmem>>, %arg5: memref<1x4x128xf32, #tpu.memory_space<vmem>>, %arg6: memref<1x4x128xf32, #tpu.memory_space<vmem>>, %arg7: memref<1x4x128xf32, #tpu.memory_space<vmem>>) attributes {dimension_semantics = [#tpu.dimension_semantics<parallel>, #tpu.dimension_semantics<arbitrary>, #tpu.dimension_semantics<arbitrary>], iteration_bounds = array<i64: 1, 2, 1>, scalar_prefetch = 0 : i64, scratch_operands = 0 : i64, tpu.core_type = #tpu.core_type<tc>, window_params = [{transform_indices = @transform_0, window_bounds = array<i64: 1, 4, 256>}, {transform_indices = @transform_1, window_bounds = array<i64: 1, 1, 256>}, {transform_indices = @transform_2, window_bounds = array<i64: 1, 4, 128>}, {transform_indices = @transform_3, window_bounds = array<i64: 1, 4, 128>}, {transform_indices = @transform_4, window_bounds = array<i64: 1, 4, 128>}]} {
    %c0_i32 = arith.constant 0 : i32
    %0 = arith.cmpi eq, %arg1, %c0_i32 : i32
    %c0_i32_0 = arith.constant 0 : i32
    %1 = arith.cmpi eq, %arg2, %c0_i32_0 : i32
    %2 = arith.andi %0, %1 : i1
    %3 = arith.extui %2 : i1 to i32
    %c0_i32_1 = arith.constant 0 : i32
    %4 = arith.cmpi ne, %3, %c0_i32_1 : i32
    scf.if %4 {
      %cst_38 = arith.constant 0.000000e+00 : f32
      %75 = vector.broadcast %cst_38 : f32 to vector<4x128xf32>
      %c0_39 = arith.constant 0 : index
      %c0_40 = arith.constant 0 : index
      %c0_41 = arith.constant 0 : index
      %76 = vector.load %arg5[%c0_39, %c0_40, %c0_41] : memref<1x4x128xf32, #tpu.memory_space<vmem>>, vector<1x4x128xf32>
      %77 = vector.shape_cast %76 : vector<1x4x128xf32> to vector<4x128xf32>
      %78 = vector.shape_cast %75 : vector<4x128xf32> to vector<1x4x128xf32>
      tpu.vector_store %arg5[%c0_39, %c0_40, %c0_41], %78 {strides = array<i32>} : memref<1x4x128xf32, #tpu.memory_space<vmem>>, vector<1x4x128xf32>,
      %cst_42 = arith.constant 0.000000e+00 : f32
      %79 = vector.broadcast %cst_42 : f32 to vector<4x128xf32>
      %c0_43 = arith.constant 0 : index
      %c0_44 = arith.constant 0 : index
      %c0_45 = arith.constant 0 : index
      %80 = vector.load %arg6[%c0_43, %c0_44, %c0_45] : memref<1x4x128xf32, #tpu.memory_space<vmem>>, vector<1x4x128xf32>
      %81 = vector.shape_cast %80 : vector<1x4x128xf32> to vector<4x128xf32>
      %82 = vector.shape_cast %79 : vector<4x128xf32> to vector<1x4x128xf32>
      tpu.vector_store %arg6[%c0_43, %c0_44, %c0_45], %82 {strides = array<i32>} : memref<1x4x128xf32, #tpu.memory_space<vmem>>, vector<1x4x128xf32>,
      %cst_46 = arith.constant 0.000000e+00 : f32
      %83 = vector.broadcast %cst_46 : f32 to vector<4x128xf32>
      %c0_47 = arith.constant 0 : index
      %c0_48 = arith.constant 0 : index
      %c0_49 = arith.constant 0 : index
      %84 = vector.load %arg7[%c0_47, %c0_48, %c0_49] : memref<1x4x128xf32, #tpu.memory_space<vmem>>, vector<1x4x128xf32>
      %85 = vector.shape_cast %84 : vector<1x4x128xf32> to vector<4x128xf32>
      %86 = vector.shape_cast %83 : vector<4x128xf32> to vector<1x4x128xf32>
      tpu.vector_store %arg7[%c0_47, %c0_48, %c0_49], %86 {strides = array<i32>} : memref<1x4x128xf32, #tpu.memory_space<vmem>>, vector<1x4x128xf32>,
    } else {
    }
    %c1_i32 = arith.constant 1 : i32
    %5 = arith.muli %arg0, %c1_i32 : i32
    %6 = arith.addi %5, %arg2 : i32
    %c256_i32 = arith.constant 256 : i32
    %7 = arith.muli %6, %c256_i32 : i32
    %8 = tpu.iota {dimensions = array<i32: 1>} : vector<1x128xi32>
    %9 = tpu.iota {dimensions = array<i32: 0>} : vector<4x128xi32>
    %c0 = arith.constant 0 : index
    %c0_2 = arith.constant 0 : index
    %c0_3 = arith.constant 0 : index
    %10 = vector.load %arg5[%c0, %c0_2, %c0_3] : memref<1x4x128xf32, #tpu.memory_space<vmem>>, vector<1x4x128xf32>
    %11 = vector.shape_cast %10 : vector<1x4x128xf32> to vector<4x128xf32>
    %c0_4 = arith.constant 0 : index
    %c0_5 = arith.constant 0 : index
    %c0_6 = arith.constant 0 : index
    %12 = vector.load %arg6[%c0_4, %c0_5, %c0_6] : memref<1x4x128xf32, #tpu.memory_space<vmem>>, vector<1x4x128xf32>
    %13 = vector.shape_cast %12 : vector<1x4x128xf32> to vector<4x128xf32>
    %c0_7 = arith.constant 0 : index
    %c0_8 = arith.constant 0 : index
    %c0_9 = arith.constant 0 : index
    %14 = vector.load %arg7[%c0_7, %c0_8, %c0_9] : memref<1x4x128xf32, #tpu.memory_space<vmem>>, vector<1x4x128xf32>
    %15 = vector.shape_cast %14 : vector<1x4x128xf32> to vector<4x128xf32>
    %c0_10 = arith.constant 0 : index
    %c0_11 = arith.constant 0 : index
    %c0_12 = arith.constant 0 : index
    %16 = vector.load %arg3[%c0_10, %c0_11, %c0_12] : memref<1x4x256xf32, #tpu.memory_space<vmem>>, vector<1x4x128xf32>
    %17 = vector.shape_cast %16 : vector<1x4x128xf32> to vector<4x128xf32>
    %c0_13 = arith.constant 0 : index
    %c0_14 = arith.constant 0 : index
    %c0_15 = arith.constant 0 : index
    %18 = vector.load %arg4[%c0_13, %c0_14, %c0_15] : memref<1x1x256xi32, #tpu.memory_space<vmem>>, vector<1x1x128xi32>
    %19 = vector.shape_cast %18 : vector<1x1x128xi32> to vector<1x128xi32>
    %c0_i32_16 = arith.constant 0 : i32
    %20 = arith.addi %7, %c0_i32_16 : i32
    %21 = vector.broadcast %20 : i32 to vector<1x128xi32>
    %22 = arith.addi %21, %8 : vector<1x128xi32>
    %c256_i32_17 = arith.constant 256 : i32
    %23 = vector.broadcast %c256_i32_17 : i32 to vector<1x128xi32>
    %24 = arith.cmpi slt, %22, %23 : vector<1x128xi32>
    %cst = arith.constant 0.000000e+00 : f32
    %25 = vector.shape_cast %24 : vector<1x128xi1> to vector<1x128xi1>
    %26 = vector.broadcast %25 : vector<1x128xi1> to vector<4x128xi1>
    %27 = vector.broadcast %cst : f32 to vector<4x128xf32>
    %28 = arith.select %26, %17, %27 : vector<4x128xi1>, vector<4x128xf32>
    %29 = vector.broadcast %19 : vector<1x128xi32> to vector<4x128xi32>
    %30 = arith.cmpi eq, %29, %9 : vector<4x128xi32>
    %31 = vector.broadcast %24 : vector<1x128xi1> to vector<4x128xi1>
    %32 = arith.andi %31, %30 : vector<4x128xi1>
    %cst_18 = arith.constant 1.000000e+00 : f32
    %cst_19 = arith.constant 0.000000e+00 : f32
    %33 = vector.broadcast %cst_18 : f32 to vector<4x128xf32>
    %34 = vector.broadcast %cst_19 : f32 to vector<4x128xf32>
    %35 = arith.select %32, %33, %34 : vector<4x128xi1>, vector<4x128xf32>
    %36 = arith.mulf %28, %35 : vector<4x128xf32>
    %37 = arith.addf %11, %36 : vector<4x128xf32>
    %38 = arith.mulf %28, %28 : vector<4x128xf32>
    %39 = arith.addf %13, %38 : vector<4x128xf32>
    %40 = arith.addf %15, %35 : vector<4x128xf32>
    %c0_20 = arith.constant 0 : index
    %c0_21 = arith.constant 0 : index
    %c128 = arith.constant 128 : index
    %41 = vector.load %arg3[%c0_20, %c0_21, %c128] : memref<1x4x256xf32, #tpu.memory_space<vmem>>, vector<1x4x128xf32>
    %42 = vector.shape_cast %41 : vector<1x4x128xf32> to vector<4x128xf32>
    %c0_22 = arith.constant 0 : index
    %c0_23 = arith.constant 0 : index
    %c128_24 = arith.constant 128 : index
    %43 = vector.load %arg4[%c0_22, %c0_23, %c128_24] : memref<1x1x256xi32, #tpu.memory_space<vmem>>, vector<1x1x128xi32>
    %44 = vector.shape_cast %43 : vector<1x1x128xi32> to vector<1x128xi32>
    %c128_i32 = arith.constant 128 : i32
    %45 = arith.addi %7, %c128_i32 : i32
    %46 = vector.broadcast %45 : i32 to vector<1x128xi32>
    %47 = arith.addi %46, %8 : vector<1x128xi32>
    %c256_i32_25 = arith.constant 256 : i32
    %48 = vector.broadcast %c256_i32_25 : i32 to vector<1x128xi32>
    %49 = arith.cmpi slt, %47, %48 : vector<1x128xi32>
    %cst_26 = arith.constant 0.000000e+00 : f32
    %50 = vector.shape_cast %49 : vector<1x128xi1> to vector<1x128xi1>
    %51 = vector.broadcast %50 : vector<1x128xi1> to vector<4x128xi1>
    %52 = vector.broadcast %cst_26 : f32 to vector<4x128xf32>
    %53 = arith.select %51, %42, %52 : vector<4x128xi1>, vector<4x128xf32>
    %54 = vector.broadcast %44 : vector<1x128xi32> to vector<4x128xi32>
    %55 = arith.cmpi eq, %54, %9 : vector<4x128xi32>
    %56 = vector.broadcast %49 : vector<1x128xi1> to vector<4x128xi1>
    %57 = arith.andi %56, %55 : vector<4x128xi1>
    %cst_27 = arith.constant 1.000000e+00 : f32
    %cst_28 = arith.constant 0.000000e+00 : f32
    %58 = vector.broadcast %cst_27 : f32 to vector<4x128xf32>
    %59 = vector.broadcast %cst_28 : f32 to vector<4x128xf32>
    %60 = arith.select %57, %58, %59 : vector<4x128xi1>, vector<4x128xf32>
    %61 = arith.mulf %53, %60 : vector<4x128xf32>
    %62 = arith.addf %37, %61 : vector<4x128xf32>
    %63 = arith.mulf %53, %53 : vector<4x128xf32>
    %64 = arith.addf %39, %63 : vector<4x128xf32>
    %65 = arith.addf %40, %60 : vector<4x128xf32>
    %c0_29 = arith.constant 0 : index
    %c0_30 = arith.constant 0 : index
    %c0_31 = arith.constant 0 : index
    %66 = vector.load %arg5[%c0_29, %c0_30, %c0_31] : memref<1x4x128xf32, #tpu.memory_space<vmem>>, vector<1x4x128xf32>
    %67 = vector.shape_cast %66 : vector<1x4x128xf32> to vector<4x128xf32>
    %68 = vector.shape_cast %62 : vector<4x128xf32> to vector<1x4x128xf32>
    tpu.vector_store %arg5[%c0_29, %c0_30, %c0_31], %68 {strides = array<i32>} : memref<1x4x128xf32, #tpu.memory_space<vmem>>, vector<1x4x128xf32>,
    %c0_32 = arith.constant 0 : index
    %c0_33 = arith.constant 0 : index
    %c0_34 = arith.constant 0 : index
    %69 = vector.load %arg6[%c0_32, %c0_33, %c0_34] : memref<1x4x128xf32, #tpu.memory_space<vmem>>, vector<1x4x128xf32>
    %70 = vector.shape_cast %69 : vector<1x4x128xf32> to vector<4x128xf32>
    %71 = vector.shape_cast %64 : vector<4x128xf32> to vector<1x4x128xf32>
    tpu.vector_store %arg6[%c0_32, %c0_33, %c0_34], %71 {strides = array<i32>} : memref<1x4x128xf32, #tpu.memory_space<vmem>>, vector<1x4x128xf32>,
    %c0_35 = arith.constant 0 : index
    %c0_36 = arith.constant 0 : index
    %c0_37 = arith.constant 0 : index
    %72 = vector.load %arg7[%c0_35, %c0_36, %c0_37] : memref<1x4x128xf32, #tpu.memory_space<vmem>>, vector<1x4x128xf32>
    %73 = vector.shape_cast %72 : vector<1x4x128xf32> to vector<4x128xf32>
    %74 = vector.shape_cast %65 : vector<4x128xf32> to vector<1x4x128xf32>
    tpu.vector_store %arg7[%c0_35, %c0_36, %c0_37], %74 {strides = array<i32>} : memref<1x4x128xf32, #tpu.memory_space<vmem>>, vector<1x4x128xf32>,
    return
  }
  func.func @transform_0(%arg0: i32, %arg1: i32, %arg2: i32) -> (i32, i32, i32) {
    %c1_i32 = arith.constant 1 : i32
    %0 = arith.muli %arg0, %c1_i32 : i32
    %1 = arith.addi %0, %arg2 : i32
    %c0_i32 = arith.constant 0 : i32
    %2 = arith.minsi %1, %c0_i32 : i32
    %c0_i32_0 = arith.constant 0 : i32
    %c0_i32_1 = arith.constant 0 : i32
    return %arg1, %c0_i32_0, %2 : i32, i32, i32
  }
  func.func @transform_1(%arg0: i32, %arg1: i32, %arg2: i32) -> (i32, i32, i32) {
    %c1_i32 = arith.constant 1 : i32
    %0 = arith.muli %arg0, %c1_i32 : i32
    %1 = arith.addi %0, %arg2 : i32
    %c0_i32 = arith.constant 0 : i32
    %2 = arith.minsi %1, %c0_i32 : i32
    %c0_i32_0 = arith.constant 0 : i32
    %c0_i32_1 = arith.constant 0 : i32
    return %arg1, %c0_i32_0, %2 : i32, i32, i32
  }
  func.func @transform_2(%arg0: i32, %arg1: i32, %arg2: i32) -> (i32, i32, i32) {
    %c0_i32 = arith.constant 0 : i32
    %c0_i32_0 = arith.constant 0 : i32
    %c0_i32_1 = arith.constant 0 : i32
    return %arg0, %c0_i32, %c0_i32_0 : i32, i32, i32
  }
  func.func @transform_3(%arg0: i32, %arg1: i32, %arg2: i32) -> (i32, i32, i32) {
    %c0_i32 = arith.constant 0 : i32
    %c0_i32_0 = arith.constant 0 : i32
    %c0_i32_1 = arith.constant 0 : i32
    return %arg0, %c0_i32, %c0_i32_0 : i32, i32, i32
  }
  func.func @transform_4(%arg0: i32, %arg1: i32, %arg2: i32) -> (i32, i32, i32) {
    %c0_i32 = arith.constant 0 : i32
    %c0_i32_0 = arith.constant 0 : i32
    %c0_i32_1 = arith.constant 0 : i32
    return %arg0, %c0_i32, %c0_i32_0 : i32, i32, i32
  }
}

</mosaic_0001>

<bundles_post_ra>
// kernel: tpu_custom_call.1
= control target key start
LH: loop header
LB: loop body
LE: loop exit
PB: predicated region body
PF: predicated region fallthrough
CT: control target
= control target key end

     0   :  { %10 = vsyncpa [#allocation3], 0  ;;  %s1108_s0 = inlined_call_operand.hbm [shape: f32[2,4,256], index: 0, kind: input, shape index: {}]   ;;  %s1109_s1 = inlined_call_operand.hbm [shape: s32[2,1,256], index: 1, kind: input, shape index: {}]   ;;  %s1110_s2 = inlined_call_operand.hbm [shape: f32[1,4,128], index: 2, kind: output, shape index: {0}]   ;;  %s1111_s3 = inlined_call_operand.hbm [shape: f32[1,4,128], index: 3, kind: output, shape index: {1}]   ;;  %s1112_s4 = inlined_call_operand.hbm [shape: f32[1,4,128], index: 4, kind: output, shape index: {2}]  }
   0x1   :  { %12 = vsyncpa [#allocation3 + $0x1], 0 }
   0x2   :  { %13 = vsyncpa [#allocation6], 0 }
   0x3   :  { %15 = vsyncpa [#allocation6 + $0x1], 0 }
   0x4   :  { %16 = vsyncpa [#allocation4], 0 }
   0x5   :  { %17 = vsyncpa [#allocation9], 0  ;;  %s862_s15 = smov 0   ;;  %s864_s16 = smov 0  }
   0x6   :  { %s866_s17 = smov 0   ;;  %s868_s18 = smov 0  }
   0x7   :  { %s870_s19 = smov 0   ;;  %s872_s20 = smov 0  }
   0x8 LB: > { %s519_s21 = sadd.s32 4294967295, %s828_s20   ;;  %s38_s22 = sadd.s32 1, %s824_s19  ;;  %s828_s20 = sphi %s872_s20, %s23_s20   ;;  %s824_s19 = sphi %s870_s19, %s1127_s19   ;;  %s820_s18 = sphi %s868_s18, %s1126_s18   ;;  %s816_s17 = sphi %s866_s17, %s1125_s17   ;;  %s812_s16 = sphi %s864_s16, %s1124_s16   ;;  %s808_s15 = sphi %s862_s15, %s1123_s15  }
   0x9   : > { %p40_p0 = scmp.ge.s32.totalorder %s38_s22, 2  ;;  %s57_s23 = sadd.s32 1, %s816_s17 }
   0xa   : > { %p64_p1 = scmp.ne.s32.totalorder %s816_s17, %s812_s16  ;;  %p65_p2 = scmp.eq.s32.totalorder %s828_s20, 0 }
   0xb   : > { %s1129_s22 = smov (%p40_p0, %s38_s22), 0  ;;  %p70_p4 = scmp.ne.s32.totalorder %s812_s16, %s808_s15 }
   0xc   : > { %p898_p3 = por %p65_p2, %p64_p1  ;;  %s52_s25 = ssub.s32 %s824_s19, %s1129_s22 }
   0xd   : > { %p71_p5 = scmp.eq.s32.totalorder %s519_s21, 0  ;;  %p55_p6 = scmp.eq.s32.totalorder %s52_s25, 0 }
   0xe   : > { %p568_p8 = scmp.lt.s32.totalorder %s828_s20, 2  ;;  %s916_s28 = sand.u32 1, %s816_s17  }
   0xf   : > { %p907_p7 = por %p71_p5, %p70_p4  ;;  %s542_s29 = sshll.u32 %s824_s19, 7 }
  0x10   : > { %s913_s27 = scalar_select %p55_p6, %s816_s17, %s57_s23  }
  0x11   : > { %s1115_s26 = scalar_select %p907_p7, 1, 0 }
  0x12   : > { %s522_s30 = sshll.u32 %s916_s28, 3  ;;  %s923_s7 = scalar_lea.hbm %s1108_s0, %s542_s29 }
  0x13   : > { %s210_s8 = scalar_lea.vmem [#allocation2], %s522_s30  ;;  %p927_p9 = pnand %p568_p8, %p898_p3 }
  0x14   : > { %s223_s9 = sshll.u32 %s210_s8, 4  ;;  %s207_s11 = scalar_lea.sflag [#allocation3], %s916_s28  ;;  %s931_s9 = int_to_ptr.vmem [resolvable:$true] %s223_s9 }
  0x15   : > { %s628_s12 = scalar_lea.hbm %s923_s7, 128  ;;  %p630_p13 = pneg %p927_p9 }
  0x16   : > { %p629_p12 = scmp.ne.s32.totalorder %s923_s7, %s628_s12  ;;  %s633_s15 = scalar_lea.hbm %s1108_s0, 256 }
  0x17   : > { %p634_p2 = scmp.lt.u32.totalorder %s923_s7, %s1108_s0  ;;  %p635_p3 = scmp.lt.u32.totalorder %s633_s15, %s628_s12 }
  0x18   : > { %p631_p0 = pnand %p630_p13, %p629_p12  ;;  %p637_p5 = scmp.lt.u32.totalorder %s628_s12, %s923_s7 }
  0x19   : > { %p636_p4 = por %p635_p3, %p634_p2 }
  0x1a   : > { %p632_p1 = pneg %p631_p0 }
  0x1b   : > { %p638_p6 = por %p637_p5, %p636_p4 }
  0x1d   : > { %p639_p8 = pnand %p638_p6, %p632_p1 }
  0x1f   : > { %642 = shalt.err (!%p639_p8)
}
  0x20   : > { %s643_s25 = scalar_lea.vmem %s931_s9, 128  ;;  %s830_s29 = smov [#allocation2]  }
  0x21   : > { %p644_p12 = scmp.ne.s32.totalorder %s931_s9, %s643_s25  ;;  %s648_s30 = sshll.u32 %s830_s29, 4  ;;  %s649_s30 = int_to_ptr.vmem [resolvable:$false] %s648_s30 }
  0x22   : > { %s650_s5 = scalar_lea.vmem %s649_s30, 256  ;;  %p651_p11 = scmp.lt.s32.totalorder %s931_s9, %s649_s30 }
  0x23   : > { %p646_p0 = pnand %p644_p12, %p630_p13  ;;  %p652_p2 = scmp.lt.s32.totalorder %s650_s5, %s643_s25 }
  0x25   : > { %p647_p10 = pneg %p646_p0  ;;  %p653_p3 = por %p652_p2, %p651_p11 }
  0x27   : > { %p654_p4 = pnand %p653_p3, %p647_p10 }
  0x29   : > { %657 = shalt.err (!%p654_p4)
}
  0x2a   : > { %564 = dma.hbm_to_vmem [thread:$0]  (!%p927_p9), %s923_s7, 128, %s931_s9, %s207_s11  }
  0x2b   : > { %p1117_p1 = scmp.lt.s32.totalorder %s828_s20, 3  ;;  %p1118_p5 = scmp.ge.s32.totalorder %s828_s20, 1 }
  0x2c   : > { %s525_s8 = sshll.u32 %s916_s28, 1  ;;  %s543_s12 = sshll.u32 %s824_s19, 5 }
  0x2d   : > { %p965_p6 = pnand %p1118_p5, %p1117_p1  ;;  %s974_s15 = scalar_lea.hbm %s1109_s1, %s543_s12 }
  0x2e   : > { %s234_s23 = scalar_lea.vmem [#allocation5], %s525_s8  ;;  %s231_s7 = scalar_lea.sflag [#allocation6], %s916_s28 }
  0x2f   : > { %s1119_s6 = scalar_select %p965_p6, 1, 0 }
  0x30   : > { %s247_s24 = sshll.u32 %s234_s23, 4  ;;  %s658_s9 = scalar_lea.hbm %s974_s15, 32  ;;  %s248_s24 = int_to_ptr.vmem [resolvable:$true] %s247_s24 }
  0x31   : > { %p659_p10 = scmp.ne.s32.totalorder %s974_s15, %s658_s9  ;;  %s663_s29 = scalar_lea.hbm %s1109_s1, 64 }
  0x32   : > { %p664_p12 = scmp.lt.u32.totalorder %s974_s15, %s1109_s1  ;;  %p665_p0 = scmp.lt.u32.totalorder %s663_s29, %s658_s9 }
  0x33   : > { %p661_p11 = pnand %p659_p10, %p630_p13  ;;  %p667_p3 = scmp.lt.u32.totalorder %s658_s9, %s974_s15 }
  0x34   : > { %p666_p2 = por %p665_p0, %p664_p12 }
  0x35   : > { %p662_p8 = pneg %p661_p11 }
  0x36   : > { %p668_p4 = por %p667_p3, %p666_p2 }
  0x38   : > { %p669_p1 = pnand %p668_p4, %p662_p8 }
  0x3a   : > { %672 = shalt.err (!%p669_p1)
}
  0x3b   : > { %s673_s28 = scalar_lea.vmem %s248_s24, 32  ;;  %s831_s8 = smov [#allocation5]  }
  0x3c   : > { %p674_p5 = scmp.ne.s32.totalorder %s248_s24, %s673_s28  ;;  %s678_s12 = sshll.u32 %s831_s8, 4  ;;  %s679_s12 = int_to_ptr.vmem [resolvable:$false] %s678_s12 }
  0x3d   : > { %s680_s13 = scalar_lea.vmem %s679_s12, 64  ;;  %p681_p7 = scmp.lt.s32.totalorder %s248_s24, %s679_s12 }
  0x3e   : > { %p676_p10 = pnand %p674_p5, %p630_p13  ;;  %p682_p6 = scmp.lt.s32.totalorder %s680_s13, %s673_s28 }
  0x40   : > { %p677_p11 = pneg %p676_p10  ;;  %p683_p0 = por %p682_p6, %p681_p7 }
  0x42   : > { %p684_p12 = pnand %p683_p0, %p677_p11 }
  0x44   : > { %687 = shalt.err (!%p684_p12)
}
  0x45   : > { %567 = dma.hbm_to_vmem [thread:$0]  (!%p927_p9), %s974_s15, 32, %s248_s24, %s231_s7  }
  0x46   : > { %p1120_p8 = scmp.ne.s32.totalorder %s1119_s6, 0 }
  0x47   : > { %s258_s14 = sand.u32 (!%p1120_p8), 1, %s812_s16   ;;  %p1121_p13 = scmp.ne.s32.totalorder (!%p1120_p8), %s1115_s26, 0 }
  0x48   : > { %256 = sbr.rel (%p1120_p8) target bundleno = 164 (0xa4), region = 28  ;;  %s529_s23 = sshll.u32 (!%p1120_p8), %s258_s14, 3 }
  0x49   : > { %s259_s9 = scalar_lea.sflag (!%p1120_p8), [#allocation3], %s258_s14  ;;  %s262_s11 = scalar_lea.vmem (!%p1120_p8), [#allocation2], %s529_s23 }
  0x4f   : > { %791 = dma.done.wait (%p1121_p13), %s259_s9, 128  }
  0x50   : > { %793 = vsyncadd (%p1121_p13), %s259_s9, 4294967168  ;;  %s530_s25 = sshll.u32 %s258_s14, 1  ;;  %s268_s29 = scalar_lea.sflag [#allocation6], %s258_s14 }
  0x51   : > { %s271_s10 = scalar_lea.vmem [#allocation5], %s530_s25 }
  0x52   : > { %795 = dma.done.wait (%p1121_p13), %s268_s29, 32  }
  0x53   : > { %797 = vsyncadd (%p1121_p13), %s268_s29, 4294967264  ;;  %p304_p7 = scmp.eq.s32.totalorder %s820_s18, 0 }
  0x54   : > { %v832_v0 = vmov (%p304_p7), 0.0  }
  0x55   : > { %309 = sbr.rel (!%p304_p7) target bundleno = 92 (0x5c), region = 40  ;;  %310 = vst [vmem:[#allocation7] sm:$0xf] (%p304_p7), %v832_v0  ;;  %311 = vst [vmem:[#allocation8] sm:$0xf] (%p304_p7), %v832_v0 }
  0x56   : > { %312 = vst [vmem:[#allocation10] sm:$0xf] (%p304_p7), %v832_v0 }
  0x5c PF: > { %v320_v1 = vld [vmem:[#allocation8] sm:$0xf]  ;;  %v322_v2 = vld [vmem:[%s262_s11] sm:$0xf]  ;;  %v342_v3 = vld [vmem:[%s262_s11 + $0x4] sm:$0xf]  ;;  %v317_v4 = vlaneseq }
  0x5d   : > { %v339_v5 = vmul.f32 %v322_v2, %v322_v2  ;;  %v360_v6 = vmul.f32 %v342_v3, %v342_v3  ;;  %v532_v7 = vld [vmem:[%s271_s10] ss:$0 sm:$0xff]  ;;  %v533_v9 = vld [vmem:[%s271_s10 + $0x1] ss:$0 sm:$0xff]  ;;  %v321_v11 = vld [vmem:[#allocation10] sm:$0xf] }
  0x5e   : > { %v318_v8 = vshrl.u32 %v317_v4, 7  ;;  %s833_s26 = smov [#allocation8]   ;;  %p1010_p9 = scmp.eq.s32.totalorder %s519_s21, 1  ;;  %v319_v13 = vld [vmem:[#allocation7] sm:$0xf]  ;;  %v834_v14 = vmov 0.0  }
  0x5f   : > { %v340_v10 = vadd.f32 %v339_v5, %v320_v1  ;;  %s388_s18 = sshll.u32 %s833_s26, 4  ;;  %s835_s15 = smov [#allocation10]   ;;  %s389_s18 = int_to_ptr.vmem [resolvable:$true] %s388_s18 }
  0x60   : > { %vm334_vm0 = vcmp.eq.s32.totalorder %v532_v7, %v318_v8  ;;  %vm355_vm1 = vcmp.eq.s32.totalorder %v533_v9, %v318_v8  ;;  %s401_s24 = sshll.u32 %s835_s15, 4  ;;  %s836_s7 = smov [#allocation7]   ;;  %s1014_s24 = int_to_ptr.vmem [resolvable:$true] %s401_s24 }
  0x61   : > { %v361_v12 = vadd.f32 %v360_v6, %v340_v10  ;;  %v336_v15 = vsel %vm334_vm0, 1.0, %v834_v14  ;;  %v357_v16 = vsel %vm355_vm1, 1.0, %v834_v14  ;;  %s375_s30 = sshll.u32 %s836_s7, 4  ;;  %s688_s21 = scalar_lea.vmem %s389_s18, 64  ;;  %s1034_s30 = int_to_ptr.vmem [resolvable:$true] %s375_s30 }
  0x62   : > { %v337_v17 = vmul.f32 %v336_v15, %v322_v2  ;;  %v358_v18 = vmul.f32 %v357_v16, %v342_v3  ;;  %v341_v19 = vadd.f32 %v336_v15, %v321_v11  ;;  %p689_p6 = scmp.ne.s32.totalorder %s389_s18, %s688_s21  ;;  %p695_p4 = scmp.lt.s32.totalorder %s389_s18, %s389_s18 }
  0x63   : > { %364 = vst [vmem:[#allocation8] sm:$0xf] %v361_v12  ;;  %p696_p1 = scmp.lt.s32.totalorder %s688_s21, %s688_s21 }
  0x64   : > { %v338_v20 = vadd.f32 %v337_v17, %v319_v13  ;;  %v362_v21 = vadd.f32 %v357_v16, %v341_v19  ;;  %p690_p2 = pnand %p689_p6, %p1010_p9 }
  0x65   : > { %p697_p5 = por %p696_p1, %p695_p4 }
  0x66   : > { %p691_p3 = pneg %p690_p2 }
  0x68   : > { %p698_p10 = pnand %p697_p5, %p691_p3 }
  0x6a   : > { %701 = shalt.err (!%p698_p10)
}
  0x6b   : > { %s702_s8 = scalar_lea.hbm %s1111_s3, 64 }
  0x6c   : > { %p703_p11 = scmp.ne.s32.totalorder %s1111_s3, %s702_s8  ;;  %p708_p8 = scmp.lt.u32.totalorder %s702_s8, %s1111_s3 }
  0x6e   : > { %p704_p0 = pnand %p703_p11, %p1010_p9 }
  0x70   : > { %p705_p12 = pneg %p704_p0 }
  0x72   : > { %p710_p13 = pnand %p708_p8, %p705_p12 }
  0x74   : > { %713 = shalt.err (!%p710_p13)
}
  0x75   : > { %552 = dma.vmem_to_hbm [thread:$0]  (%p1010_p9), %s389_s18, 64, %s1111_s3, [#allocation9]   ;;  %v359_v22 = vadd.f32 %v358_v18, %v338_v20  ;;  %365 = vst [vmem:[#allocation10] sm:$0xf] %v362_v21 }
  0x76   : > { %s714_s25 = scalar_lea.vmem %s1014_s24, 64  ;;  %p721_p3 = scmp.lt.s32.totalorder %s1014_s24, %s1014_s24 }
  0x77   : > { %p715_p7 = scmp.ne.s32.totalorder %s1014_s24, %s714_s25  ;;  %p722_p4 = scmp.lt.s32.totalorder %s714_s25, %s714_s25 }
  0x79   : > { %p716_p6 = pnand %p715_p7, %p1010_p9  ;;  %p723_p1 = por %p722_p4, %p721_p3 }
  0x7b   : > { %p717_p2 = pneg %p716_p6 }
  0x7d   : > { %p724_p5 = pnand %p723_p1, %p717_p2 }
  0x7f   : > { %727 = shalt.err (!%p724_p5)
}
  0x80   : > { %s728_s26 = scalar_lea.hbm %s1112_s4, 64 }
  0x81   : > { %p729_p10 = scmp.ne.s32.totalorder %s1112_s4, %s728_s26  ;;  %p734_p12 = scmp.lt.u32.totalorder %s728_s26, %s1112_s4 }
  0x83   : > { %p730_p11 = pnand %p729_p10, %p1010_p9 }
  0x85   : > { %p731_p0 = pneg %p730_p11 }
  0x87   : > { %p736_p8 = pnand %p734_p12, %p731_p0 }
  0x89   : > { %739 = shalt.err (!%p736_p8)
}
  0x8a   : > { %554 = dma.vmem_to_hbm [thread:$0]  (%p1010_p9), %s1014_s24, 64, %s1112_s4, [#allocation9]   ;;  %363 = vst [vmem:[#allocation7] sm:$0xf] %v359_v22 }
  0x8b   : > { %s740_s8 = scalar_lea.vmem %s1034_s30, 64  ;;  %p747_p2 = scmp.lt.s32.totalorder %s1034_s30, %s1034_s30 }
  0x8c   : > { %p741_p13 = scmp.ne.s32.totalorder %s1034_s30, %s740_s8  ;;  %p748_p3 = scmp.lt.s32.totalorder %s740_s8, %s740_s8 }
  0x8e   : > { %p742_p7 = pnand %p741_p13, %p1010_p9  ;;  %p749_p4 = por %p748_p3, %p747_p2 }
  0x90   : > { %p743_p6 = pneg %p742_p7 }
  0x92   : > { %p750_p1 = pnand %p749_p4, %p743_p6 }
  0x94   : > { %753 = shalt.err (!%p750_p1)
}
  0x95   : > { %s754_s14 = scalar_lea.hbm %s1110_s2, 64 }
  0x96   : > { %p755_p5 = scmp.ne.s32.totalorder %s1110_s2, %s754_s14  ;;  %p760_p0 = scmp.lt.u32.totalorder %s754_s14, %s1110_s2 }
  0x98   : > { %p756_p10 = pnand %p755_p5, %p1010_p9 }
  0x9a   : > { %p757_p11 = pneg %p756_p10 }
  0x9c   : > { %p762_p12 = pnand %p760_p0, %p757_p11 }
  0x9e   : > { %765 = shalt.err (!%p762_p12)
}
  0x9f   : > { %550 = dma.vmem_to_hbm [thread:$0]  (%p1010_p9), %s1034_s30, 64, %s1110_s2, [#allocation4]  }
  0xa0   : > { %799 = dma.done.wait (%p1010_p9), [#allocation4], 64  }
  0xa1   : > { %801 = vsyncadd (%p1010_p9), [#allocation4], 4294967232 }
  0xa2   : > { %803 = dma.done.wait (%p1010_p9), [#allocation9], 128  }
  0xa3   : > { %805 = vsyncadd (%p1010_p9), [#allocation9], 4294967168 }
  0xa4 PF: > { %s23_s20 = sadd.s32 1, %s828_s20   ;;  %s1123_s15 = smov %s812_s16 }
  0xa5   : > { %p20_p8 = scmp.ge.s32.totalorder %s23_s20, 4   ;;  %s1124_s16 = smov %s816_s17 }
  0xa6   : > { %s1125_s17 = smov %s913_s27  ;;  %s1126_s18 = smov %s824_s19 }
  0xa7   : > { %s1127_s19 = smov %s1129_s22  ;;  %22 = sbr.rel (!%p20_p8) target bundleno = 8 (0x8), region = 101 }
  0xae   :  { %422 = vsyncpa [#allocation3], 1 }
  0xaf   :  { %424 = vsyncpa [#allocation3 + $0x1], 1 }
  0xb0   :  { %425 = vsyncpa [#allocation6], 1 }
  0xb1   :  { %427 = vsyncpa [#allocation6 + $0x1], 1 }
  0xb2   :  { %428 = vsyncpa [#allocation4], 1 }
  0xb3   :  { %430 = vsyncpa [#allocation4 + $0x1], 1 }
  0xb4   :  { %431 = vsyncpa [#allocation9], 1 }

</bundles_post_ra>
